<compile_context>
chip_gen: v6e
topology: v6e:2x2x1
jax: 0.10.0
libtpu: 0.0.40
codegen_flags: <defaults>
</compile_context>

<pallas_src>
import functools

import jax
import jax.numpy as jnp
from jax.experimental import pallas as pl
from jax.experimental.pallas import tpu as pltpu


def gdn_kernel(x_ref, gamma_ref, beta_ref, o_ref, *, inverse):
    """One (batch, spatial-tile) block of GDN.

    x_ref     : (C, TILE_HW)  input features (spatial flattened, padded)
    gamma_ref : (C, C)        reparameterized gamma (VMEM-resident)
    beta_ref  : (C, 1)        reparameterized beta  (VMEM-resident)
    o_ref     : (C, TILE_HW)  output
    """
    x = x_ref[...]                                    # (C, TILE_HW) f32
    xsq = x * x
    # 1x1 conv:  norm[i, p] = sum_j gamma[i, j] * x[j, p]^2 + beta[i]
    norm = (jnp.dot(gamma_ref[...], xsq, preferred_element_type=jnp.float32)
            + beta_ref[...])                          # (C, TILE_HW)
    if inverse:
        o_ref[...] = x * jnp.sqrt(norm)               # IGDN
    else:
        o_ref[...] = x * jax.lax.rsqrt(norm)          # GDN (rsqrt -> EUP)


def gdn(x, beta_param, gamma_param, *, inverse=False,
        beta_min=1e-6, reparam_offset=2.0 ** -18):
    """Mirrors GDN.forward.  x: (B, C, H, W) or (B, C, D, W, H) float32."""
    orig_shape = x.shape
    if x.ndim == 5:                                   # "unfold" path of the module
        b5, c5, d5, w5, h5 = x.shape
        x = x.reshape(b5, c5, d5 * w5, h5)
    B, C, H, W = x.shape
    assert beta_param.shape == (C,)
    assert gamma_param.shape == (C, C)

    # ---- batch-invariant LowerBound reparameterization (hoisted, tiny) ----
    pedestal = reparam_offset ** 2
    beta_bound = (beta_min + pedestal) ** 0.5
    gamma_bound = reparam_offset
    beta_eff = jnp.maximum(beta_param, beta_bound) ** 2 - pedestal     # (C,)
    gamma_eff = jnp.maximum(gamma_param, gamma_bound) ** 2 - pedestal  # (C, C)

    # ---- flatten + pad spatial to a multiple of 128 (lane-dense stores) ----
    LANE = 128
    HW = H * W
    x_flat = x.reshape(B, C, HW)
    HW_pad = ((HW + LANE - 1) // LANE) * LANE
    if HW_pad != HW:
        # Zero padding is safe: norm = beta > 0 there, output stays 0.
        x_flat = jnp.pad(x_flat, ((0, 0), (0, 0), (0, HW_pad - HW)))

    # ---- pick the largest HW tile that divides HW_pad and fits the budget --
    # Double-buffered footprint ~= 2*(x tile + out tile) = 4 * C*tile*4 bytes;
    # a 4 MiB per-buffer cap keeps us well inside v7x's 64 MiB VMEM.
    tile_budget_bytes = 4 * 1024 * 1024
    tile = min(LANE, HW_pad)
    cand = LANE
    while cand <= HW_pad:
        if HW_pad % cand == 0 and C * cand * 4 <= tile_budget_bytes:
            tile = cand
        cand += LANE
    n_hw = HW_pad // tile

    kernel = functools.partial(gdn_kernel, inverse=inverse)

    out_flat = pl.pallas_call(
        kernel,
        out_shape=jax.ShapeDtypeStruct((B, C, HW_pad), x.dtype),
        grid_spec=pltpu.PrefetchScalarGridSpec(
            num_scalar_prefetch=0,
            grid=(B, n_hw),
            in_specs=[
                # streamed x tile: (batch squeezed, full C, HW tile)
                pl.BlockSpec((pl.Squeezed(), C, tile), lambda b, t: (b, 0, t)),
                # gamma / beta: constant index_map -> resident across the grid
                pl.BlockSpec((C, C), lambda b, t: (0, 0)),
                pl.BlockSpec((C, 1), lambda b, t: (0, 0)),
            ],
            out_specs=pl.BlockSpec((pl.Squeezed(), C, tile),
                                   lambda b, t: (b, 0, t)),
        ),
        compiler_params=pltpu.CompilerParams(
            dimension_semantics=("parallel", "parallel"),   # megacore on v7x
            vmem_limit_bytes=64 * 1024 * 1024,
        ),
    )(x_flat, gamma_eff, beta_eff.reshape(C, 1))

    out = out_flat[:, :, :HW].reshape(B, C, H, W)
    if len(orig_shape) == 5:
        out = out.reshape(orig_shape)
    return out


def gdn_reference(x, beta_param, gamma_param, *, inverse=False,
                  beta_min=1e-6, reparam_offset=2.0 ** -18):
    """Pure-JAX reference reproducing the PyTorch GDN.forward (4-D input)."""
    pedestal = reparam_offset ** 2
    beta_bound = (beta_min + pedestal) ** 0.5
    gamma_bound = reparam_offset
    beta = jnp.maximum(beta_param, beta_bound) ** 2 - pedestal
    gamma = jnp.maximum(gamma_param, gamma_bound) ** 2 - pedestal
    norm = jnp.einsum("ij,bjhw->bihw", gamma, x * x) + beta[None, :, None, None]
    norm = jnp.sqrt(norm)
    return x * norm if inverse else x / norm


if __name__ == "__main__":
    B, C, H, W = 2, 8, 16, 16           # HW = 256 (multiple of 128)
    gamma_init = 0.1
    reparam_offset = 2.0 ** -18
    beta_min = 1e-6
    pedestal = reparam_offset ** 2

    key = jax.random.PRNGKey(0)
    kx, kb, kg = jax.random.split(key, 3)

    x = jax.random.normal(kx, (B, C, H, W), dtype=jnp.float32)

    # GDN.build() initialization plus a small deterministic positive
    # perturbation so the off-diagonal gamma terms are actually exercised.
    beta_param = (jnp.sqrt(jnp.ones((C,), jnp.float32) + pedestal)
                  + 0.05 * jnp.abs(jax.random.normal(kb, (C,), jnp.float32)))
    gamma_param = (jnp.sqrt(gamma_init * jnp.eye(C, dtype=jnp.float32) + pedestal)
                   + 0.02 * jnp.abs(jax.random.normal(kg, (C, C), jnp.float32)))

    # Forward GDN.
    out = gdn(x, beta_param, gamma_param, inverse=False,
              beta_min=beta_min, reparam_offset=reparam_offset)
    out = jax.block_until_ready(out)
    ref = gdn_reference(x, beta_param, gamma_param, inverse=False,
                        beta_min=beta_min, reparam_offset=reparam_offset)
    assert out.shape == (B, C, H, W)
    assert jnp.allclose(out, ref, atol=1e-5, rtol=1e-5), "GDN mismatch vs reference"

    # Inverse GDN (IGDN) path.
    out_inv = jax.block_until_ready(
        gdn(x, beta_param, gamma_param, inverse=True,
            beta_min=beta_min, reparam_offset=reparam_offset))
    ref_inv = gdn_reference(x, beta_param, gamma_param, inverse=True,
                            beta_min=beta_min, reparam_offset=reparam_offset)
    assert jnp.allclose(out_inv, ref_inv, atol=1e-5, rtol=1e-5), "IGDN mismatch"

    print("KERNEL_OK")
</pallas_src>

<mosaic_0001>
module attributes {stable_mosaic.version = 11 : i64} {
  func.func @gdn_kernel(%arg0: i32, %arg1: i32, %arg2: memref<1x8x256xf32, #tpu.memory_space<vmem>>, %arg3: memref<8x8xf32, #tpu.memory_space<vmem>>, %arg4: memref<8x1xf32, #tpu.memory_space<vmem>>, %arg5: memref<1x8x256xf32, #tpu.memory_space<vmem>>) attributes {dimension_semantics = [#tpu.dimension_semantics<parallel>, #tpu.dimension_semantics<parallel>], iteration_bounds = array<i64: 2, 1>, scalar_prefetch = 0 : i64, scratch_operands = 0 : i64, tpu.core_type = #tpu.core_type<tc>, window_params = [{transform_indices = @transform_0, window_bounds = array<i64: 1, 8, 256>}, {pipeline_mode = #tpu.pipeline_mode<synchronous>, transform_indices = @transform_1, window_bounds = array<i64: 8, 8>}, {pipeline_mode = #tpu.pipeline_mode<synchronous>, transform_indices = @transform_2, window_bounds = array<i64: 8, 1>}, {transform_indices = @transform_3, window_bounds = array<i64: 1, 8, 256>}]} {
    %c0 = arith.constant 0 : index
    %c0_0 = arith.constant 0 : index
    %c0_1 = arith.constant 0 : index
    %0 = vector.load %arg2[%c0, %c0_0, %c0_1] : memref<1x8x256xf32, #tpu.memory_space<vmem>>, vector<1x8x256xf32>
    %1 = vector.shape_cast %0 : vector<1x8x256xf32> to vector<8x256xf32>
    %2 = arith.mulf %1, %1 : vector<8x256xf32>
    %c0_2 = arith.constant 0 : index
    %c0_3 = arith.constant 0 : index
    %3 = vector.load %arg3[%c0_2, %c0_3] : memref<8x8xf32, #tpu.memory_space<vmem>>, vector<8x8xf32>
    %cst = arith.constant dense<0.000000e+00> : vector<8x256xf32>
    %4 = tpu.matmul %3, %2, %cst {dimension_numbers = #tpu.dot_dimension_numbers<[1], [0], [0], [1], [0, 0, 1, 1], [], []>} : vector<8x8xf32>, vector<8x256xf32>, vector<8x256xf32> -> vector<8x256xf32>
    %c0_4 = arith.constant 0 : index
    %c0_5 = arith.constant 0 : index
    %5 = vector.load %arg4[%c0_4, %c0_5] : memref<8x1xf32, #tpu.memory_space<vmem>>, vector<8x1xf32>
    %6 = vector.broadcast %5 : vector<8x1xf32> to vector<8x256xf32>
    %7 = arith.addf %4, %6 : vector<8x256xf32>
    %8 = math.rsqrt %7 : vector<8x256xf32>
    %9 = arith.mulf %1, %8 : vector<8x256xf32>
    %c0_6 = arith.constant 0 : index
    %c0_7 = arith.constant 0 : index
    %c0_8 = arith.constant 0 : index
    %10 = vector.load %arg5[%c0_6, %c0_7, %c0_8] : memref<1x8x256xf32, #tpu.memory_space<vmem>>, vector<1x8x256xf32>
    %11 = vector.shape_cast %10 : vector<1x8x256xf32> to vector<8x256xf32>
    %12 = vector.shape_cast %9 : vector<8x256xf32> to vector<1x8x256xf32>
    tpu.vector_store %arg5[%c0_6, %c0_7, %c0_8], %12 {strides = array<i32>} : memref<1x8x256xf32, #tpu.memory_space<vmem>>, vector<1x8x256xf32>,
    return
  }
  func.func @transform_0(%arg0: i32, %arg1: i32) -> (i32, i32, i32) {
    %c0_i32 = arith.constant 0 : i32
    %c0_i32_0 = arith.constant 0 : i32
    return %arg0, %c0_i32, %arg1 : i32, i32, i32
  }
  func.func @transform_1(%arg0: i32, %arg1: i32) -> (i32, i32) {
    %c0_i32 = arith.constant 0 : i32
    %c0_i32_0 = arith.constant 0 : i32
    %c0_i32_1 = arith.constant 0 : i32
    return %c0_i32, %c0_i32_0 : i32, i32
  }
  func.func @transform_2(%arg0: i32, %arg1: i32) -> (i32, i32) {
    %c0_i32 = arith.constant 0 : i32
    %c0_i32_0 = arith.constant 0 : i32
    %c0_i32_1 = arith.constant 0 : i32
    return %c0_i32, %c0_i32_0 : i32, i32
  }
  func.func @transform_3(%arg0: i32, %arg1: i32) -> (i32, i32, i32) {
    %c0_i32 = arith.constant 0 : i32
    %c0_i32_0 = arith.constant 0 : i32
    return %arg0, %c0_i32, %arg1 : i32, i32, i32
  }
}

</mosaic_0001>

<bundles_post_ra>
// kernel: tpu_custom_call.1
= control target key start
LH: loop header
LB: loop body
LE: loop exit
PB: predicated region body
PF: predicated region fallthrough
CT: control target
= control target key end

     0   :  { %8 = vsyncpa [#allocation3], 0  ;;  %s761_s0 = inlined_call_operand.hbm [shape: f32[2,8,256], index: 0, kind: input, shape index: {}]   ;;  %s762_s1 = inlined_call_operand.vmem [shape: f32[8,8], index: 1, kind: input, shape index: {}]   ;;  %s763_s2 = inlined_call_operand.vmem [shape: f32[8,1], index: 2, kind: input, shape index: {}]   ;;  %s764_s3 = inlined_call_operand.hbm [shape: f32[2,8,256], index: 3, kind: output, shape index: {}]  }
   0x1   :  { %10 = vsyncpa [#allocation3 + $0x1], 0 }
   0x2   :  { %11 = vsyncpa [#allocation4], 0 }
   0x3   :  { %13 = vsyncpa [#allocation4 + $0x1], 0  ;;  %s621_s12 = smov 0   ;;  %s623_s13 = smov 0  }
   0x4   :  { %s625_s14 = smov 0   ;;  %s627_s15 = smov 0  }
   0x5   :  { %s629_s16 = smov 0   ;;  %s631_s17 = smov 0  }
   0x6 LB: > { %s400_s18 = sadd.s32 4294967295, %s595_s17   ;;  %s401_s19 = sadd.s32 4294967294, %s595_s17   ;;  %s595_s17 = sphi %s631_s17, %s19_s17   ;;  %s591_s16 = sphi %s629_s16, %s776_s16   ;;  %s587_s15 = sphi %s627_s15, %s775_s15   ;;  %s583_s14 = sphi %s625_s14, %s774_s14   ;;  %s579_s13 = sphi %s623_s13, %s773_s13   ;;  %s575_s12 = sphi %s621_s12, %s772_s12  }
   0x7   : > { %s31_s20 = sadd.s32 1, %s591_s16  ;;  %s40_s21 = sadd.s32 1, %s583_s14 }
   0x8   : > { %p33_p0 = scmp.ge.s32.totalorder %s31_s20, 2  ;;  %p47_p1 = scmp.ne.s32.totalorder %s583_s14, %s579_s13 }
   0x9   : > { %p48_p2 = scmp.eq.s32.totalorder %s595_s17, 0  ;;  %p53_p3 = scmp.ne.s32.totalorder %s579_s13, %s575_s12 }
   0xa   : > { %s778_s20 = smov (%p33_p0, %s31_s20), 0  ;;  %p54_p5 = scmp.eq.s32.totalorder %s400_s18, 0 }
   0xb   : > { %p662_p4 = por %p48_p2, %p47_p1  ;;  %s35_s23 = ssub.s32 %s591_s16, %s778_s20 }
   0xc   : > { %p121_p6 = scmp.eq.s32.totalorder %s400_s18, 1  ;;  %p38_p7 = scmp.eq.s32.totalorder %s35_s23, 0 }
   0xd   : > { %p668_p8 = por %p54_p5, %p53_p3  ;;  %p127_p10 = scmp.eq.s32.totalorder %s401_s19, 1 }
   0xe   : > { %p672_p9 = por %p121_p6, %p47_p1  ;;  %p430_p13 = scmp.lt.s32.totalorder %s595_s17, 2 }
   0xf   : > { %s677_s26 = scalar_select %p38_p7, %s583_s14, %s40_s21  }
  0x10   : > { %p679_p11 = por %p127_p10, %p53_p3  ;;  %s153_s28 = sand.u32 1, %s583_s14  }
  0x11   : > { %s404_s29 = sshll.u32 %s153_s28, 4  ;;  %s416_s30 = sshll.u32 %s591_s16, 8 }
  0x12   : > { %s768_s27 = scalar_select %p679_p11, 1, 0 }
  0x13   : > { %s165_s6 = scalar_lea.hbm %s761_s0, %s416_s30  ;;  %s157_s7 = scalar_lea.vmem [#allocation2], %s404_s29 }
  0x14   : > { %s167_s8 = sshll.u32 %s157_s7, 4  ;;  %p692_p0 = pnand %p430_p13, %p662_p4  ;;  %s168_s8 = int_to_ptr.vmem [resolvable:$true] %s167_s8 }
  0x15   : > { %p407_p1 = scmp.ge.s32.totalorder %s595_s17, 1  ;;  %p172_p2 = scmp.lt.s32.totalorder %s595_s17, 3 }
  0x16   : > { %s154_s10 = scalar_lea.sflag [#allocation3], %s153_s28  ;;  %p489_p3 = pneg %p692_p0 }
  0x17   : > { %s500_s11 = scalar_lea.vmem %s168_s8, 256  ;;  %s597_s18 = smov [#allocation2]  }
  0x18   : > { %p501_p5 = scmp.ne.s32.totalorder %s168_s8, %s500_s11  ;;  %s505_s19 = sshll.u32 %s597_s18, 4  ;;  %s506_s19 = int_to_ptr.vmem [resolvable:$false] %s505_s19 }
  0x19   : > { %s507_s21 = scalar_lea.vmem %s506_s19, 512  ;;  %p508_p10 = scmp.lt.s32.totalorder %s168_s8, %s506_s19 }
  0x1a   : > { %p503_p6 = pnand %p501_p5, %p489_p3  ;;  %p509_p12 = scmp.lt.s32.totalorder %s507_s21, %s500_s11 }
  0x1c   : > { %p504_p7 = pneg %p503_p6  ;;  %p510_p4 = por %p509_p12, %p508_p10 }
  0x1e   : > { %p511_p13 = pnand %p510_p4, %p504_p7 }
  0x20   : > { %514 = shalt.err (!%p511_p13)
}
  0x21   : > { %425 = dma.hbm_to_vmem [thread:$0]  (!%p692_p0), %s165_s6, 256, %s168_s8, %s154_s10  }
  0x22   : > { %p173_p11 = pnand %p407_p1, %p172_p2 }
  0x23   : > { %s707_s22 = sand.u32 (!%p173_p11), 1, %s579_s13  }
  0x24   : > { %176 = sbr.rel (%p173_p11) target bundleno = 273 (0x111), region = 32  ;;  %s408_s23 = sshll.u32 (!%p173_p11), %s707_s22, 4 }
  0x25   : > { %s179_s28 = scalar_lea.sflag (!%p173_p11), [#allocation3], %s707_s22  ;;  %s182_s29 = scalar_lea.vmem (!%p173_p11), [#allocation2], %s408_s23 }
  0x29   : > { %566 = dma.done.wait (%p668_p8), %s179_s28, 256  }
  0x2a   : > { %568 = vsyncadd (%p668_p8), %s179_s28, 4294967040  ;;  %v598_v0 = vmov 0.0   ;;  %v599_v1 = vmov 0   ;;  %v208_v2 = vld [vmem:[%s182_s29 + $0x8] sm:$0xff]  ;;  %v207_v3 = vld [vmem:[%s182_s29] sm:$0xff]  ;;  %vm218_vm0 = vcmask 64512  }
  0x2b   : > { %286 = vmatprep.mubr.f32.mxu0 %v598_v0  ;;  %482 = vset.pattern.permute.xlu0 %v599_v1  ;;  %v210_v4 = vmul.f32 %v208_v2, %v208_v2  ;;  %v209_v5 = vmul.f32 %v207_v3, %v207_v3  ;;  %v212_v6 = vld [vmem:[%s763_s2] sm:$0xff]  ;;  %s417_s24 = sshll.u32 %s587_s15, 8  ;;  %s204_s7 = scalar_lea.vmem [#allocation5], %s408_s23 }
  0x2c   : > { %v211_v7 = vld [vmem:[%s762_s1] sm:$0xff]  ;;  %215 = vperm.xlu0 %482, %v212_v6   ;;  %s316_s8 = sshll.u32 %s204_s7, 4  ;;  %s314_s11 = scalar_lea.hbm %s764_s3, %s417_s24  ;;  %s317_s8 = int_to_ptr.vmem [resolvable:$true] %s316_s8 }
  0x2d   : > { %252 = vmatprep.subr.mxu0 %v210_v4  ;;  %s300_s18 = scalar_lea.sflag [#allocation4], %s707_s22  ;;  %s515_s19 = scalar_lea.vmem %s317_s8, 256 }
  0x2e   : > { %253 = vmatpush1.msra.mxu0 %v209_v5  ;;  %p516_p8 = scmp.ne.s32.totalorder %s317_s8, %s515_s19  ;;  %s600_s21 = smov [#allocation5]  }
  0x2f   : > { %410 = vmatmul.mubr.msk.f32.vlgmr.msra.gmra.mxu0 %vm218_vm0, %v211_v7  ;;  %s519_s15 = sshll.u32 %s600_s21, 4  ;;  %s520_s15 = int_to_ptr.vmem [resolvable:$false] %s519_s15 }
  0x30   : > { %p517_p11 = pnand %p516_p8, %p672_p9  ;;  %s521_s23 = scalar_lea.vmem %s520_s15, 512 }
  0x31   : > { %p522_p0 = scmp.lt.s32.totalorder %s317_s8, %s520_s15  ;;  %p523_p1 = scmp.lt.s32.totalorder %s521_s23, %s515_s19 }
  0x32   : > { %p518_p12 = pneg %p517_p11 }
  0x33   : > { %p524_p2 = por %p523_p1, %p522_p0 }
  0x35   : > { %p525_p3 = pnand %p524_p2, %p518_p12 }
  0xa7   : > { %v216_v8 = vpop.permute.xlu0 %215 }
  0xef   : > { %v288_v9 = vpop.f32.mrf.mxu0 }
  0xf0   : > { %v289_v10 = vadd.f32 %v288_v9, %v216_v8 }
  0xf1   : > { %v290_v11 = vpop.f32.mrf.mxu0 }
  0xf2   : > { %483 = vrsqrt.f32 %v289_v10  ;;  %v291_v12 = vadd.f32 %v290_v11, %v216_v8 }
  0xf4   : > { %485 = vrsqrt.f32 %v291_v12 }
  0xff   : > { %v484_v13 = vpop.eup %483 }
 0x100   : > { %v295_v14 = vmul.f32 %v484_v13, %v207_v3 }
 0x101   : > { %v486_v15 = vpop.eup %485 }
 0x102   : > { %v296_v16 = vmul.f32 %v486_v15, %v208_v2  ;;  %297 = vst [vmem:[%s204_s7] sm:$0xff] %v295_v14 }
 0x104   : > { %298 = vst [vmem:[%s204_s7 + $0x8] sm:$0xff] %v296_v16 }
 0x105   : > { %528 = shalt.err (!%p525_p3)
}
 0x106   : > { %s529_s28 = scalar_lea.hbm %s314_s11, 256  ;;  %s533_s30 = scalar_lea.hbm %s764_s3, 512 }
 0x107   : > { %p530_p5 = scmp.ne.s32.totalorder %s314_s11, %s529_s28  ;;  %p534_p10 = scmp.lt.s32.totalorder %s314_s11, %s764_s3 }
 0x108   : > { %p535_p4 = scmp.lt.s32.totalorder %s533_s30, %s529_s28 }
 0x109   : > { %p531_p6 = pnand %p530_p5, %p672_p9 }
 0x10a   : > { %p536_p13 = por %p535_p4, %p534_p10 }
 0x10b   : > { %p532_p7 = pneg %p531_p6 }
 0x10d   : > { %p537_p8 = pnand %p536_p13, %p532_p7 }
 0x10f   : > { %540 = shalt.err (!%p537_p8)
}
 0x110   : > { %420 = dma.vmem_to_hbm [thread:$0]  (%p672_p9), %s317_s8, 256, %s314_s11, %s300_s18  }
 0x111 PF: > { %s328_s6 = sand.u32 1, %s575_s12   ;;  %p770_p11 = scmp.ne.s32.totalorder %s768_s27, 0 }
 0x112   : > { %p771_p12 = scmp.ge.s32.totalorder %s595_s17, 2  ;;  %s329_s24 = scalar_lea.sflag [#allocation4], %s328_s6 }
 0x114   : > { %p427_p0 = pnand %p771_p12, %p770_p11 }
 0x116   : > { %p428_p1 = pneg %p427_p0 }
 0x118   : > { %570 = dma.done.wait (%p428_p1), %s329_s24, 256  }
 0x119   : > { %572 = vsyncadd (%p428_p1), %s329_s24, 4294967040  ;;  %s19_s17 = sadd.s32 1, %s595_s17   ;;  %s772_s12 = smov %s579_s13 }
 0x11a   : > { %p16_p2 = scmp.ge.s32.totalorder %s19_s17, 4   ;;  %s773_s13 = smov %s583_s14 }
 0x11b   : > { %s774_s14 = smov %s677_s26  ;;  %s775_s15 = smov %s591_s16 }
 0x11c   : > { %s776_s16 = smov %s778_s20  ;;  %18 = sbr.rel (!%p16_p2) target bundleno = 6 (0x6), region = 77 }
 0x121   :  { %334 = vsyncpa [#allocation3], 1 }
 0x122   :  { %336 = vsyncpa [#allocation3 + $0x1], 1 }
 0x123   :  { %337 = vsyncpa [#allocation4], 1 }
 0x124   :  { %339 = vsyncpa [#allocation4 + $0x1], 1 }

</bundles_post_ra>
